<compile_context>
chip_gen: v5e
topology: v5e:2x2
jax: 0.10.0
libtpu: 0.0.40
codegen_flags: <defaults>
</compile_context>

<pallas_src>
import functools

import jax
import jax.numpy as jnp
from jax.experimental import pallas as pl
from jax.experimental.pallas import tpu as pltpu


def final_layer_kernel(x_ref, shift_ref, scale_ref, w_ref, b_ref, o_ref):
    # x_ref:     (1, tile_T, H)     input tokens for this (batch, tile) step
    # shift_ref: (1, 1, H)          per-batch adaLN shift (f32)
    # scale_ref: (1, 1, H)          per-batch adaLN scale (f32)
    # w_ref:     (H, O_pad)         projection weight (lane-padded)
    # b_ref:     (1, O_pad)         projection bias (lane-padded)
    # o_ref:     (1, tile_T, O_pad) output tile
    H = x_ref.shape[2]
    inv_h = 1.0 / H

    x = x_ref[0]                                   # (tile_T, H), native dtype
    xf = x.astype(jnp.float32)

    # --- LayerNorm (no affine, eps=1e-6): one-pass statistics.
    mean = jnp.sum(xf, axis=-1, keepdims=True) * inv_h
    ex2 = jnp.sum(xf * xf, axis=-1, keepdims=True) * inv_h
    var = jnp.maximum(ex2 - mean * mean, 0.0)      # clamp vs. cancellation
    x_norm = (xf - mean) * jax.lax.rsqrt(var + 1e-6)

    # --- modulate: x * (1 + scale) + shift  (broadcast over token rows).
    shift = shift_ref[0].astype(jnp.float32)       # (1, H)
    scale = scale_ref[0].astype(jnp.float32)       # (1, H)
    x_mod = x_norm * (1.0 + scale) + shift         # (tile_T, H), f32

    # --- final projection: H -> O_pad on the MXU, f32 accumulation.
    w = w_ref[...]
    out = jnp.dot(x_mod.astype(w.dtype), w, preferred_element_type=jnp.float32)
    out = out + b_ref[...].astype(jnp.float32)
    o_ref[0] = out.astype(o_ref.dtype)


def _pick_tile_t(T, max_tile=1024, multiple=8):
    """Largest token tile <= max_tile that divides T and is a multiple of 8."""
    if T <= max_tile:
        return T
    best = 0
    for t in range(multiple, max_tile + 1, multiple):
        if T % t == 0:
            best = t
    if best:
        return best
    # TODO(synk): handle ragged T with a masked tail tile instead of whole-T.
    return T


def _build_call(B, T, H, O_pad, tile_t, out_dtype, x_dtype, w_dtype,
                single_buffer_consts):
    n_t = T // tile_t

    const_kwargs = {}
    if single_buffer_consts:
        # Grid-invariant operands: no need to double-buffer them.
        const_kwargs = dict(pipeline_mode=pl.Buffered(1))

    in_specs = [
        pl.BlockSpec((1, tile_t, H), lambda b, t: (b, t, 0)),             # x
        pl.BlockSpec((1, 1, H), lambda b, t: (b, 0, 0)),                  # shift
        pl.BlockSpec((1, 1, H), lambda b, t: (b, 0, 0)),                  # scale
        pl.BlockSpec((H, O_pad), lambda b, t: (0, 0), **const_kwargs),    # W
        pl.BlockSpec((1, O_pad), lambda b, t: (0, 0), **const_kwargs),    # bias
    ]
    out_spec = pl.BlockSpec((1, tile_t, O_pad), lambda b, t: (b, t, 0))

    # VMEM budget: double-buffered x/out tiles + weights + headroom.
    x_bytes = jnp.dtype(x_dtype).itemsize
    w_bytes = jnp.dtype(w_dtype).itemsize
    need = (2 * tile_t * H * x_bytes
            + 2 * tile_t * O_pad * x_bytes
            + 2 * H * O_pad * w_bytes
            + 4 * (2 * H + O_pad) * 4)
    vmem_limit = int(min(max(2 * need, 32 * 1024 * 1024), 48 * 1024 * 1024))

    cost = pl.CostEstimate(
        flops=2 * B * T * H * O_pad + 8 * B * T * H,
        transcendentals=B * T,
        bytes_accessed=(B * T * H * x_bytes + B * T * O_pad * x_bytes
                        + H * O_pad * w_bytes + 2 * B * H * 4
                        + O_pad * w_bytes),
    )

    return pl.pallas_call(
        final_layer_kernel,
        out_shape=jax.ShapeDtypeStruct((B, T, O_pad), out_dtype),
        grid_spec=pltpu.PrefetchScalarGridSpec(
            num_scalar_prefetch=0,
            grid=(B, n_t),
            in_specs=in_specs,
            out_specs=out_spec,
        ),
        compiler_params=pltpu.CompilerParams(
            dimension_semantics=("parallel", "parallel"),
            vmem_limit_bytes=vmem_limit,
        ),
        cost_estimate=cost,
    )


def final_layer(x, c, w_ada, b_ada, w_lin, b_lin, *, max_tile_t=1024):
    """x: (B, T, H), c: (B, H), w_ada: (H, 2H), b_ada: (2H,),
    w_lin: (H, O), b_lin: (O,)  ->  (B, T, O)."""
    B, T, H = x.shape
    O = w_lin.shape[1]

    # --- adaLN modulation hoisted out of the kernel (cheap, keeps the large
    # (H, 2H) weight out of VMEM and off the per-grid-step path).
    c32 = c.astype(jnp.float32)
    sc = (c32 * jax.nn.sigmoid(c32)) @ w_ada.astype(jnp.float32)
    sc = sc + b_ada.astype(jnp.float32)
    shift = sc[:, :H].reshape(B, 1, H)
    scale = sc[:, H:].reshape(B, 1, H)

    # --- lane-dense output: zero-pad O up to a multiple of 128 lanes.
    O_pad = pl.cdiv(O, 128) * 128
    if O_pad != O:
        w_lin_p = jnp.zeros((H, O_pad), dtype=w_lin.dtype).at[:, :O].set(w_lin)
        b_lin_p = jnp.zeros((O_pad,), dtype=b_lin.dtype).at[:O].set(b_lin)
    else:
        w_lin_p, b_lin_p = w_lin, b_lin
    b_lin_p = b_lin_p.reshape(1, O_pad)

    tile_t = _pick_tile_t(T, max_tile=max_tile_t)

    args = (x, shift, scale, w_lin_p, b_lin_p)
    build = functools.partial(_build_call, B, T, H, O_pad, tile_t,
                              x.dtype, x.dtype, w_lin_p.dtype)
    try:
        out_p = build(single_buffer_consts=True)(*args)
    except Exception:
        # pl.Buffered(1) not accepted by this jax build: default buffering.
        out_p = build(single_buffer_consts=False)(*args)

    return out_p[..., :O] if O_pad != O else out_p


def reference(x, c, w_ada, b_ada, w_lin, b_lin):
    """Pure-JAX reference mirroring the PyTorch forward."""
    c_silu = c * jax.nn.sigmoid(c)
    sc = c_silu @ w_ada + b_ada
    H = x.shape[-1]
    shift, scale = sc[:, :H], sc[:, H:]
    mean = jnp.mean(x, axis=-1, keepdims=True)
    var = jnp.mean((x - mean) ** 2, axis=-1, keepdims=True)
    x_norm = (x - mean) / jnp.sqrt(var + 1e-6)
    x_mod = x_norm * (1 + scale[:, None, :]) + shift[:, None, :]
    return x_mod @ w_lin + b_lin


if __name__ == "__main__":
    # Small shapes consistent with the module: hidden_size=32, patch_size=2,
    # out_channels=4 -> linear output dim = 2*2*4 = 16. Seq len T=8, batch B=2.
    B, T, H = 2, 8, 32
    patch_size, out_channels = 2, 4
    O = patch_size * patch_size * out_channels

    key = jax.random.PRNGKey(0)
    k1, k2, k3, k4, k5, k6 = jax.random.split(key, 6)

    x = jax.random.normal(k1, (B, T, H), dtype=jnp.float32)
    c = jax.random.normal(k2, (B, H), dtype=jnp.float32)

    # Deterministic synthetic parameters (nn.Linear weights stored transposed
    # so the kernel computes activation @ weight).
    w_ada = 0.02 * jax.random.normal(k3, (H, 2 * H), dtype=jnp.float32)
    b_ada = 0.01 * jax.random.normal(k4, (2 * H,), dtype=jnp.float32)
    w_lin = 0.02 * jax.random.normal(k5, (H, O), dtype=jnp.float32)
    b_lin = 0.01 * jax.random.normal(k6, (O,), dtype=jnp.float32)

    out = final_layer(x, c, w_ada, b_ada, w_lin, b_lin)
    out = jax.block_until_ready(out)

    ref = reference(x, c, w_ada, b_ada, w_lin, b_lin)
    assert out.shape == (B, T, O), out.shape
    assert jnp.allclose(out, ref, atol=1e-4, rtol=1e-4), (
        float(jnp.max(jnp.abs(out - ref))))

    print("KERNEL_OK")
</pallas_src>

<mosaic_0001>
module attributes {stable_mosaic.version = 11 : i64} {
  func.func @final_layer_kernel(%arg0: i32, %arg1: i32, %arg2: memref<1x8x32xf32, #tpu.memory_space<vmem>>, %arg3: memref<1x1x32xf32, #tpu.memory_space<vmem>>, %arg4: memref<1x1x32xf32, #tpu.memory_space<vmem>>, %arg5: memref<32x128xf32, #tpu.memory_space<vmem>>, %arg6: memref<1x128xf32, #tpu.memory_space<vmem>>, %arg7: memref<1x8x128xf32, #tpu.memory_space<vmem>>) attributes {dimension_semantics = [#tpu.dimension_semantics<parallel>, #tpu.dimension_semantics<parallel>], iteration_bounds = array<i64: 2, 1>, scalar_prefetch = 0 : i64, scratch_operands = 0 : i64, tpu.core_type = #tpu.core_type<tc>, window_params = [{transform_indices = @transform_0, window_bounds = array<i64: 1, 8, 32>}, {transform_indices = @transform_1, window_bounds = array<i64: 1, 1, 32>}, {transform_indices = @transform_2, window_bounds = array<i64: 1, 1, 32>}, {pipeline_mode = #tpu.pipeline_mode<synchronous>, transform_indices = @transform_3, window_bounds = array<i64: 32, 128>}, {pipeline_mode = #tpu.pipeline_mode<synchronous>, transform_indices = @transform_4, window_bounds = array<i64: 1, 128>}, {transform_indices = @transform_5, window_bounds = array<i64: 1, 8, 128>}]} {
    %c0 = arith.constant 0 : index
    %c0_0 = arith.constant 0 : index
    %c0_1 = arith.constant 0 : index
    %0 = vector.load %arg2[%c0, %c0_0, %c0_1] : memref<1x8x32xf32, #tpu.memory_space<vmem>>, vector<1x8x32xf32>
    %1 = vector.shape_cast %0 : vector<1x8x32xf32> to vector<8x32xf32>
    %cst = arith.constant dense<0.000000e+00> : vector<8xf32>
    %2 = vector.multi_reduction <add>, %1, %cst [1] : vector<8x32xf32> to vector<8xf32>
    %3 = vector.shape_cast %2 : vector<8xf32> to vector<8x1xf32>
    %cst_2 = arith.constant 3.125000e-02 : f32
    %4 = vector.broadcast %cst_2 : f32 to vector<8x1xf32>
    %5 = arith.mulf %3, %4 : vector<8x1xf32>
    %6 = arith.mulf %1, %1 : vector<8x32xf32>
    %cst_3 = arith.constant dense<0.000000e+00> : vector<8xf32>
    %7 = vector.multi_reduction <add>, %6, %cst_3 [1] : vector<8x32xf32> to vector<8xf32>
    %8 = vector.shape_cast %7 : vector<8xf32> to vector<8x1xf32>
    %cst_4 = arith.constant 3.125000e-02 : f32
    %9 = vector.broadcast %cst_4 : f32 to vector<8x1xf32>
    %10 = arith.mulf %8, %9 : vector<8x1xf32>
    %11 = arith.mulf %5, %5 : vector<8x1xf32>
    %12 = arith.subf %10, %11 : vector<8x1xf32>
    %cst_5 = arith.constant 0.000000e+00 : f32
    %13 = vector.broadcast %cst_5 : f32 to vector<8x1xf32>
    %14 = arith.maximumf %12, %13 : vector<8x1xf32>
    %15 = vector.broadcast %5 : vector<8x1xf32> to vector<8x32xf32>
    %16 = arith.subf %1, %15 : vector<8x32xf32>
    %cst_6 = arith.constant 9.99999997E-7 : f32
    %17 = vector.broadcast %cst_6 : f32 to vector<8x1xf32>
    %18 = arith.addf %14, %17 : vector<8x1xf32>
    %19 = math.rsqrt %18 : vector<8x1xf32>
    %20 = vector.broadcast %19 : vector<8x1xf32> to vector<8x32xf32>
    %21 = arith.mulf %16, %20 : vector<8x32xf32>
    %c0_7 = arith.constant 0 : index
    %c0_8 = arith.constant 0 : index
    %c0_9 = arith.constant 0 : index
    %22 = vector.load %arg3[%c0_7, %c0_8, %c0_9] : memref<1x1x32xf32, #tpu.memory_space<vmem>>, vector<1x1x32xf32>
    %23 = vector.shape_cast %22 : vector<1x1x32xf32> to vector<1x32xf32>
    %c0_10 = arith.constant 0 : index
    %c0_11 = arith.constant 0 : index
    %c0_12 = arith.constant 0 : index
    %24 = vector.load %arg4[%c0_10, %c0_11, %c0_12] : memref<1x1x32xf32, #tpu.memory_space<vmem>>, vector<1x1x32xf32>
    %25 = vector.shape_cast %24 : vector<1x1x32xf32> to vector<1x32xf32>
    %cst_13 = arith.constant 1.000000e+00 : f32
    %26 = vector.broadcast %cst_13 : f32 to vector<1x32xf32>
    %27 = arith.addf %26, %25 : vector<1x32xf32>
    %28 = vector.broadcast %27 : vector<1x32xf32> to vector<8x32xf32>
    %29 = arith.mulf %21, %28 : vector<8x32xf32>
    %30 = vector.broadcast %23 : vector<1x32xf32> to vector<8x32xf32>
    %31 = arith.addf %29, %30 : vector<8x32xf32>
    %c0_14 = arith.constant 0 : index
    %c0_15 = arith.constant 0 : index
    %32 = vector.load %arg5[%c0_14, %c0_15] : memref<32x128xf32, #tpu.memory_space<vmem>>, vector<32x128xf32>
    %cst_16 = arith.constant dense<0.000000e+00> : vector<8x128xf32>
    %33 = tpu.matmul %31, %32, %cst_16 {dimension_numbers = #tpu.dot_dimension_numbers<[1], [0], [0], [1], [0, 0, 1, 1], [], []>} : vector<8x32xf32>, vector<32x128xf32>, vector<8x128xf32> -> vector<8x128xf32>
    %c0_17 = arith.constant 0 : index
    %c0_18 = arith.constant 0 : index
    %34 = vector.load %arg6[%c0_17, %c0_18] : memref<1x128xf32, #tpu.memory_space<vmem>>, vector<1x128xf32>
    %35 = vector.broadcast %34 : vector<1x128xf32> to vector<8x128xf32>
    %36 = arith.addf %33, %35 : vector<8x128xf32>
    %c0_19 = arith.constant 0 : index
    %c0_20 = arith.constant 0 : index
    %c0_21 = arith.constant 0 : index
    %37 = vector.load %arg7[%c0_19, %c0_20, %c0_21] : memref<1x8x128xf32, #tpu.memory_space<vmem>>, vector<1x8x128xf32>
    %38 = vector.shape_cast %37 : vector<1x8x128xf32> to vector<8x128xf32>
    %39 = vector.shape_cast %36 : vector<8x128xf32> to vector<1x8x128xf32>
    tpu.vector_store %arg7[%c0_19, %c0_20, %c0_21], %39 {strides = array<i32>} : memref<1x8x128xf32, #tpu.memory_space<vmem>>, vector<1x8x128xf32>,
    return
  }
  func.func @transform_0(%arg0: i32, %arg1: i32) -> (i32, i32, i32) {
    %c0_i32 = arith.constant 0 : i32
    %c0_i32_0 = arith.constant 0 : i32
    return %arg0, %arg1, %c0_i32 : i32, i32, i32
  }
  func.func @transform_1(%arg0: i32, %arg1: i32) -> (i32, i32, i32) {
    %c0_i32 = arith.constant 0 : i32
    %c0_i32_0 = arith.constant 0 : i32
    %c0_i32_1 = arith.constant 0 : i32
    return %arg0, %c0_i32, %c0_i32_0 : i32, i32, i32
  }
  func.func @transform_2(%arg0: i32, %arg1: i32) -> (i32, i32, i32) {
    %c0_i32 = arith.constant 0 : i32
    %c0_i32_0 = arith.constant 0 : i32
    %c0_i32_1 = arith.constant 0 : i32
    return %arg0, %c0_i32, %c0_i32_0 : i32, i32, i32
  }
  func.func @transform_3(%arg0: i32, %arg1: i32) -> (i32, i32) {
    %c0_i32 = arith.constant 0 : i32
    %c0_i32_0 = arith.constant 0 : i32
    %c0_i32_1 = arith.constant 0 : i32
    return %c0_i32, %c0_i32_0 : i32, i32
  }
  func.func @transform_4(%arg0: i32, %arg1: i32) -> (i32, i32) {
    %c0_i32 = arith.constant 0 : i32
    %c0_i32_0 = arith.constant 0 : i32
    %c0_i32_1 = arith.constant 0 : i32
    return %c0_i32, %c0_i32_0 : i32, i32
  }
  func.func @transform_5(%arg0: i32, %arg1: i32) -> (i32, i32, i32) {
    %c0_i32 = arith.constant 0 : i32
    %c0_i32_0 = arith.constant 0 : i32
    return %arg0, %arg1, %c0_i32 : i32, i32, i32
  }
}

module attributes {stable_mosaic.version = 11 : i64} {
  func.func @final_layer_kernel(%arg0: i32, %arg1: i32, %arg2: memref<1x8x32xf32, #tpu.memory_space<vmem>>, %arg3: memref<1x1x32xf32, #tpu.memory_space<vmem>>, %arg4: memref<1x1x32xf32, #tpu.memory_space<vmem>>, %arg5: memref<32x128xf32, #tpu.memory_space<vmem>>, %arg6: memref<1x128xf32, #tpu.memory_space<vmem>>, %arg7: memref<1x8x128xf32, #tpu.memory_space<vmem>>) attributes {dimension_semantics = [#tpu.dimension_semantics<parallel>, #tpu.dimension_semantics<parallel>], iteration_bounds = array<i64: 2, 1>, scalar_prefetch = 0 : i64, scratch_operands = 0 : i64, tpu.core_type = #tpu.core_type<tc>, window_params = [{transform_indices = @transform_0, window_bounds = array<i64: 1, 8, 32>}, {transform_indices = @transform_1, window_bounds = array<i64: 1, 1, 32>}, {transform_indices = @transform_2, window_bounds = array<i64: 1, 1, 32>}, {pipeline_mode = #tpu.pipeline_mode<synchronous>, transform_indices = @transform_3, window_bounds = array<i64: 32, 128>}, {pipeline_mode = #tpu.pipeline_mode<synchronous>, transform_indices = @transform_4, window_bounds = array<i64: 1, 128>}, {transform_indices = @transform_5, window_bounds = array<i64: 1, 8, 128>}]} {
    %c0 = arith.constant 0 : index
    %c0_0 = arith.constant 0 : index
    %c0_1 = arith.constant 0 : index
    %0 = vector.load %arg2[%c0, %c0_0, %c0_1] : memref<1x8x32xf32, #tpu.memory_space<vmem>>, vector<1x8x32xf32>
    %1 = vector.shape_cast %0 : vector<1x8x32xf32> to vector<8x32xf32>
    %cst = arith.constant dense<0.000000e+00> : vector<8xf32>
    %2 = vector.multi_reduction <add>, %1, %cst [1] : vector<8x32xf32> to vector<8xf32>
    %3 = vector.shape_cast %2 : vector<8xf32> to vector<8x1xf32>
    %cst_2 = arith.constant 3.125000e-02 : f32
    %4 = vector.broadcast %cst_2 : f32 to vector<8x1xf32>
    %5 = arith.mulf %3, %4 : vector<8x1xf32>
    %6 = arith.mulf %1, %1 : vector<8x32xf32>
    %cst_3 = arith.constant dense<0.000000e+00> : vector<8xf32>
    %7 = vector.multi_reduction <add>, %6, %cst_3 [1] : vector<8x32xf32> to vector<8xf32>
    %8 = vector.shape_cast %7 : vector<8xf32> to vector<8x1xf32>
    %cst_4 = arith.constant 3.125000e-02 : f32
    %9 = vector.broadcast %cst_4 : f32 to vector<8x1xf32>
    %10 = arith.mulf %8, %9 : vector<8x1xf32>
    %11 = arith.mulf %5, %5 : vector<8x1xf32>
    %12 = arith.subf %10, %11 : vector<8x1xf32>
    %cst_5 = arith.constant 0.000000e+00 : f32
    %13 = vector.broadcast %cst_5 : f32 to vector<8x1xf32>
    %14 = arith.maximumf %12, %13 : vector<8x1xf32>
    %15 = vector.broadcast %5 : vector<8x1xf32> to vector<8x32xf32>
    %16 = arith.subf %1, %15 : vector<8x32xf32>
    %cst_6 = arith.constant 9.99999997E-7 : f32
    %17 = vector.broadcast %cst_6 : f32 to vector<8x1xf32>
    %18 = arith.addf %14, %17 : vector<8x1xf32>
    %19 = math.rsqrt %18 : vector<8x1xf32>
    %20 = vector.broadcast %19 : vector<8x1xf32> to vector<8x32xf32>
    %21 = arith.mulf %16, %20 : vector<8x32xf32>
    %c0_7 = arith.constant 0 : index
    %c0_8 = arith.constant 0 : index
    %c0_9 = arith.constant 0 : index
    %22 = vector.load %arg3[%c0_7, %c0_8, %c0_9] : memref<1x1x32xf32, #tpu.memory_space<vmem>>, vector<1x1x32xf32>
    %23 = vector.shape_cast %22 : vector<1x1x32xf32> to vector<1x32xf32>
    %c0_10 = arith.constant 0 : index
    %c0_11 = arith.constant 0 : index
    %c0_12 = arith.constant 0 : index
    %24 = vector.load %arg4[%c0_10, %c0_11, %c0_12] : memref<1x1x32xf32, #tpu.memory_space<vmem>>, vector<1x1x32xf32>
    %25 = vector.shape_cast %24 : vector<1x1x32xf32> to vector<1x32xf32>
    %cst_13 = arith.constant 1.000000e+00 : f32
    %26 = vector.broadcast %cst_13 : f32 to vector<1x32xf32>
    %27 = arith.addf %26, %25 : vector<1x32xf32>
    %28 = vector.broadcast %27 : vector<1x32xf32> to vector<8x32xf32>
    %29 = arith.mulf %21, %28 : vector<8x32xf32>
    %30 = vector.broadcast %23 : vector<1x32xf32> to vector<8x32xf32>
    %31 = arith.addf %29, %30 : vector<8x32xf32>
    %c0_14 = arith.constant 0 : index
    %c0_15 = arith.constant 0 : index
    %32 = vector.load %arg5[%c0_14, %c0_15] : memref<32x128xf32, #tpu.memory_space<vmem>>, vector<32x128xf32>
    %cst_16 = arith.constant dense<0.000000e+00> : vector<8x128xf32>
    %33 = tpu.matmul %31, %32, %cst_16 {dimension_numbers = #tpu.dot_dimension_numbers<[1], [0], [0], [1], [0, 0, 1, 1], [], []>} : vector<8x32xf32>, vector<32x128xf32>, vector<8x128xf32> -> vector<8x128xf32>
    %c0_17 = arith.constant 0 : index
    %c0_18 = arith.constant 0 : index
    %34 = vector.load %arg6[%c0_17, %c0_18] : memref<1x128xf32, #tpu.memory_space<vmem>>, vector<1x128xf32>
    %35 = vector.broadcast %34 : vector<1x128xf32> to vector<8x128xf32>
    %36 = arith.addf %33, %35 : vector<8x128xf32>
    %c0_19 = arith.constant 0 : index
    %c0_20 = arith.constant 0 : index
    %c0_21 = arith.constant 0 : index
    %37 = vector.load %arg7[%c0_19, %c0_20, %c0_21] : memref<1x8x128xf32, #tpu.memory_space<vmem>>, vector<1x8x128xf32>
    %38 = vector.shape_cast %37 : vector<1x8x128xf32> to vector<8x128xf32>
    %39 = vector.shape_cast %36 : vector<8x128xf32> to vector<1x8x128xf32>
    tpu.vector_store %arg7[%c0_19, %c0_20, %c0_21], %39 {strides = array<i32>} : memref<1x8x128xf32, #tpu.memory_space<vmem>>, vector<1x8x128xf32>,
    return
  }
  func.func @transform_0(%arg0: i32, %arg1: i32) -> (i32, i32, i32) {
    %c0_i32 = arith.constant 0 : i32
    %c0_i32_0 = arith.constant 0 : i32
    return %arg0, %arg1, %c0_i32 : i32, i32, i32
  }
  func.func @transform_1(%arg0: i32, %arg1: i32) -> (i32, i32, i32) {
    %c0_i32 = arith.constant 0 : i32
    %c0_i32_0 = arith.constant 0 : i32
    %c0_i32_1 = arith.constant 0 : i32
    return %arg0, %c0_i32, %c0_i32_0 : i32, i32, i32
  }
  func.func @transform_2(%arg0: i32, %arg1: i32) -> (i32, i32, i32) {
    %c0_i32 = arith.constant 0 : i32
    %c0_i32_0 = arith.constant 0 : i32
    %c0_i32_1 = arith.constant 0 : i32
    return %arg0, %c0_i32, %c0_i32_0 : i32, i32, i32
  }
  func.func @transform_3(%arg0: i32, %arg1: i32) -> (i32, i32) {
    %c0_i32 = arith.constant 0 : i32
    %c0_i32_0 = arith.constant 0 : i32
    %c0_i32_1 = arith.constant 0 : i32
    return %c0_i32, %c0_i32_0 : i32, i32
  }
  func.func @transform_4(%arg0: i32, %arg1: i32) -> (i32, i32) {
    %c0_i32 = arith.constant 0 : i32
    %c0_i32_0 = arith.constant 0 : i32
    %c0_i32_1 = arith.constant 0 : i32
    return %c0_i32, %c0_i32_0 : i32, i32
  }
  func.func @transform_5(%arg0: i32, %arg1: i32) -> (i32, i32, i32) {
    %c0_i32 = arith.constant 0 : i32
    %c0_i32_0 = arith.constant 0 : i32
    return %arg0, %arg1, %c0_i32 : i32, i32, i32
  }
}

</mosaic_0001>

<bundles_post_ra>
// kernel: tpu_custom_call.1
= control target key start
LH: loop header
LB: loop body
LE: loop exit
PB: predicated region body
PF: predicated region fallthrough
CT: control target
= control target key end

     0   :  { %s1096_s0 = inlined_call_operand.hbm [shape: f32[2,8,32], index: 0, kind: input, shape index: {}]   ;;  %s1097_s1 = inlined_call_operand.hbm [shape: f32[2,1,32], index: 1, kind: input, shape index: {}]   ;;  %s1098_s2 = inlined_call_operand.hbm [shape: f32[2,1,32], index: 2, kind: input, shape index: {}]   ;;  %s1099_s3 = inlined_call_operand.hbm [shape: f32[32,128], index: 3, kind: input, shape index: {}]   ;;  %s1100_s4 = inlined_call_operand.vmem [shape: f32[1,128], index: 4, kind: input, shape index: {}]   ;;  %s1101_s5 = inlined_call_operand.hbm [shape: f32[2,8,128], index: 5, kind: output, shape index: {}]  }
   0x1   :  { %1110 = sst [smem:[#allocation22_spill]] %s1097_s1 }
   0x2   :  { %1111 = sst [smem:[#allocation23_spill]] %s1099_s3 }
   0x3   :  { %1112 = sst [smem:[#allocation24_spill]] %s1100_s4 }
   0x4   :  { %10 = vsyncpa [#allocation3], 0 }
   0x5   :  { %12 = vsyncpa [#allocation3 + $0x1], 0 }
   0x6   :  { %13 = vsyncpa [#allocation6], 0 }
   0x7   :  { %15 = vsyncpa [#allocation6 + $0x1], 0 }
   0x8   :  { %16 = vsyncpa [#allocation9], 0 }
   0x9   :  { %17 = vsyncpa [#allocation4], 0 }
   0xa   :  { %19 = vsyncpa [#allocation4 + $0x1], 0  ;;  %s905_s18 = smov 0   ;;  %s907_s19 = smov 0  }
   0xb   :  { %s909_s20 = smov 0   ;;  %s911_s21 = smov 0  }
   0xc   :  { %s913_s22 = smov 0   ;;  %s915_s23 = smov 0  }
   0xd LB: > { %1113 = sst [smem:[#allocation15_spill]] %s850_s18  ;;  %s936_s24 = sadd.s32 4294967295, %s870_s23   ;;  %s870_s23 = sphi %s915_s23, %s25_s23   ;;  %s866_s22 = sphi %s913_s22, %s1138_s22   ;;  %s862_s21 = sphi %s911_s21, %s1137_s21   ;;  %s858_s20 = sphi %s909_s20, %s1133_s20   ;;  %s854_s19 = sphi %s907_s19, %s1136_s19   ;;  %s850_s18 = sphi %s905_s18, %s1135_s18  }
   0xe   : > { %1114 = sst [smem:[#allocation16_spill]] %s858_s20  ;;  %s556_s25 = sadd.s32 4294967294, %s870_s23  }
   0xf   : > { %1115 = sst [smem:[#allocation17_spill]] %s870_s23  ;;  %s37_s26 = sadd.s32 1, %s866_s22 }
  0x10   : > { %s46_s27 = sadd.s32 1, %s858_s20  ;;  %p39_p0 = scmp.ge.s32.totalorder %s37_s26, 2 }
  0x11   : > { %p53_p1 = scmp.ne.s32.totalorder %s858_s20, %s854_s19  ;;  %p54_p2 = scmp.eq.s32.totalorder %s870_s23, 0 }
  0x12   : > { %p59_p3 = scmp.ne.s32.totalorder %s854_s19, %s850_s18  ;;  %s1140_s26 = smov (%p39_p0, %s37_s26), 0 }
  0x13   : > { %1116 = sst [smem:[#allocation18_spill]] %s1140_s26  ;;  %p55_p4 = por %p54_p2, %p53_p1 }
  0x14   : > { %p179_p5 = scmp.eq.s32.totalorder %s936_s24, 1  ;;  %s41_s28 = ssub.s32 %s866_s22, %s1140_s26 }
  0x15   : > { %p185_p6 = scmp.eq.s32.totalorder %s556_s25, 1  ;;  %p44_p7 = scmp.eq.s32.totalorder %s41_s28, 0 }
  0x16   : > { %p951_p8 = por %p179_p5, %p53_p1  ;;  %p559_p10 = scmp.ge.s32.totalorder %s870_s23, 2 }
  0x17   : > { %p958_p9 = por %p185_p6, %p59_p3  ;;  %p602_p11 = scmp.lt.s32.totalorder %s870_s23, 2 }
  0x18   : > { %s1117_s29 = scalar_select %p951_p8, 1, 0 }
  0x19   : > { %s1119_s30 = scalar_select %p958_p9, 1, 0 }
  0x1a   : > { %1118 = sst [smem:[#allocation19_spill]] %s1117_s29  ;;  %s968_s7 = sand.u32 1, %s858_s20  }
  0x1b   : > { %1120 = sst [smem:[#allocation20_spill]] %s1119_s30  ;;  %s242_s8 = sand.u32 1, %s870_s23  }
  0x1c   : > { %s963_s6 = scalar_select %p44_p7, %s858_s20, %s46_s27  }
  0x1d   : > { %p971_p12 = pnand %p602_p11, %p55_p4  ;;  %s1123_s1 = sld [smem:[#allocation22_spill]] }
  0x1e   : > { %1121 = sst [smem:[#allocation21_spill]] %s963_s6  ;;  %s245_s14 = scalar_lea.vmem [#allocation5], %s968_s7 }
  0x1f   : > { %s252_s15 = sshll.u32 %s245_s14, 4  ;;  %s980_s16 = scalar_lea.sflag [#allocation6], %s242_s8  ;;  %s253_s15 = int_to_ptr.vmem [resolvable:$true] %s252_s15 }
  0x20   : > { %p60_p13 = scmp.eq.s32.totalorder %s936_s24, 0  ;;  %p557_p0 = scmp.ge.s32.totalorder %s870_s23, 1 }
  0x21   : > { %p192_p1 = scmp.lt.s32.totalorder %s870_s23, 3  ;;  %s1125_s3 = sld [smem:[#allocation23_spill]] }
  0x22   : > { %p993_p2 = por %p60_p13, %p59_p3  ;;  %s872_s8 = smov [#allocation8]  }
  0x23   : > { %s248_s12 = scalar_lea.hbm %s1123_s1, %s866_s22  ;;  %p1000_p4 = pnand %p557_p0, %p192_p1 }
  0x24   : > { %s250_s13 = sshll.u32 %s248_s12, 4  ;;  %s205_s11 = sshll.u32 %s872_s8, 4  ;;  %s251_s13 = int_to_ptr.hbm [resolvable:$true] %s250_s13  ;;  %s206_s11 = int_to_ptr.vmem [resolvable:$true] %s205_s11 }
  0x25   : > { %593 = dma.hbm_to_vmem [thread:$0]  (!%p971_p12), %s251_s13, 16, %s253_s15, %s980_s16  }
  0x26   : > { %p583_p5 = pneg %p1000_p4  ;;  %s560_s12 = sshll.u32 %s968_s7, 3 }
  0x27   : > { %s203_s28 = sshll.u32 %s1125_s3, 4  ;;  %s561_s13 = sshll.u32 %s866_s22, 3  ;;  %s204_s28 = int_to_ptr.hbm [resolvable:$true] %s203_s28 }
  0x28   : > { %p584_p3 = pnand %p583_p5, %p60_p13  ;;  %s873_s14 = smov 128  }
  0x29   : > { %s874_s15 = smov 8   ;;  %s231_s1 = scalar_lea.hbm %s1096_s0, %s561_s13 }
  0x2a   : > { %586 = dma.hbm_to_vmem [thread:$0]  (!%p584_p3), %s204_s28, 512, %s206_s11, [#allocation9], %s873_s14, %s873_s14, %s874_s15  }
  0x2b   : > { %s226_s3 = scalar_lea.vmem [#allocation2], %s560_s12  ;;  %s233_s6 = sshll.u32 %s231_s1, 4  ;;  %s234_s6 = int_to_ptr.hbm [resolvable:$true] %s233_s6 }
  0x2c   : > { %s235_s26 = sshll.u32 %s226_s3, 4  ;;  %s223_s8 = scalar_lea.sflag [#allocation3], %s968_s7  ;;  %s236_s26 = int_to_ptr.vmem [resolvable:$true] %s235_s26 }
  0x2d   : > { %590 = dma.hbm_to_vmem [thread:$0]  (!%p971_p12), %s234_s6, 128, %s236_s26, %s223_s8  }
  0x2e   : > { %s265_s30 = scalar_lea.hbm %s1098_s2, %s866_s22  ;;  %s262_s18 = scalar_lea.vmem [#allocation7], %s968_s7 }
  0x2f   : > { %s269_s4 = sshll.u32 %s262_s18, 4  ;;  %s267_s29 = sshll.u32 %s265_s30, 4  ;;  %s270_s4 = int_to_ptr.vmem [resolvable:$true] %s269_s4  ;;  %s268_s29 = int_to_ptr.hbm [resolvable:$true] %s267_s29 }
  0x30   : > { %596 = dma.hbm_to_vmem [thread:$0]  (!%p971_p12), %s268_s29, 16, %s270_s4, %s980_s16  }
  0x31   : > { %278 = sbr.rel (%p1000_p4) target bundleno = 349 (0x15d), region = 40  ;;  %s1027_s1 = sand.u32 (!%p1000_p4), 1, %s854_s19  }
  0x32   : > { %s563_s3 = sshll.u32 (!%p1000_p4), %s1027_s1, 3  ;;  %s281_s20 = scalar_lea.sflag (!%p1000_p4), [#allocation3], %s1027_s1 }
  0x33   : > { %s284_s23 = scalar_lea.vmem (!%p1000_p4), [#allocation2], %s563_s3 }
  0x36   : > { %833 = dma.done.wait (%p993_p2), %s281_s20, 128  }
  0x37   : > { %835 = vsyncadd (%p993_p2), %s281_s20, 4294967168  ;;  %s290_s4 = sand.u32 1, %s936_s24   ;;  %s293_s26 = scalar_lea.vmem [#allocation5], %s1027_s1 }
  0x38   : > { %s291_s18 = scalar_lea.sflag [#allocation6], %s290_s4 }
  0x39   : > { %837 = dma.done.wait (%p993_p2), %s291_s18, 32  }
  0x3a   : > { %839 = vsyncadd (%p993_p2), %s291_s18, 4294967264  ;;  %s302_s29 = scalar_lea.vmem [#allocation7], %s1027_s1 }
  0x3b   : > { %841 = dma.done.wait (%p60_p13), [#allocation9], 512  }
  0x3c   : > { %843 = vsyncadd (%p60_p13), [#allocation9], 4294966784  ;;  %vm344_vm0 = vcmask 261120   ;;  %v343_v0 = vld [vmem:[%s284_s23] sm:$0xff]  ;;  %v381_v8 = vld [vmem:[#allocation8] sm:$0xff]  ;;  %s568_s24 = sshll.u32 %s862_s21, 3 }
  0x3d   : > { %v345_v1 = vsel %vm344_vm0, %v343_v0, 0.0  ;;  %v349_v2 = vmul.f32 %v343_v0, %v343_v0  ;;  %v384_v5 = vld [vmem:[#allocation8 + $0x18] sm:$0xff]  ;;  %v383_v6 = vld [vmem:[#allocation8 + $0x10] sm:$0xff]  ;;  %v382_v7 = vld [vmem:[#allocation8 + $0x8] sm:$0xff]  ;;  %s425_s9 = scalar_lea.hbm %s1101_s5, %s568_s24  ;;  %s1128_s28 = sld [smem:[#allocation24_spill]] }
  0x3e   : > { %346 = vadd.xlane.f32.xlu0 %v345_v1  ;;  %404 = vmatpush.msra.mxu0 %v384_v5  ;;  %v371_v19 = vld [vmem:[%s302_s29] sm:$0x1]  ;;  %s342_s10 = scalar_lea.vmem [#allocation10], %s563_s3  ;;  %s429_s12 = sshll.u32 %s425_s9, 4  ;;  %s430_s12 = int_to_ptr.hbm [resolvable:$true] %s429_s12 }
  0x3f   : > { %v350_v3 = vsel %vm344_vm0, %v349_v2, 0.0  ;;  %v372_v21 = vadd.f32 1.0, %v371_v19  ;;  %v656_v28 = vld [vmem:[%s293_s26] ss:$0 sm:$0xff]  ;;  %s427_s11 = sshll.u32 %s342_s10, 4  ;;  %s414_s13 = scalar_lea.sflag [#allocation4], %s1027_s1  ;;  %s428_s11 = int_to_ptr.vmem [resolvable:$true] %s427_s11 }
  0x40   : > { %405 = vmatpush.msra.mxu0 %v383_v6  ;;  %s794_s21 = sshra.s32 %s430_s12, 4  ;;  %s800_s27 = scalar_lea.hbm %s1101_s5, 16  ;;  %s795_s21 = int_to_ptr.hbm [resolvable:$true] %s794_s21 }
  0x41   : > { %v374_v25 = vperm.slane %v372_v21, 0  ;;  %s796_s14 = scalar_lea.hbm %s795_s21, 8  ;;  %p801_p12 = scmp.lt.s32.totalorder %s795_s21, %s1101_s5 }
  0x42   : > { %406 = vmatpush.msra.mxu0 %v382_v7  ;;  %p797_p6 = scmp.ne.s32.totalorder %s795_s21, %s796_s14  ;;  %p802_p13 = scmp.lt.s32.totalorder %s800_s27, %s796_s14 }
  0x43   : > { %v657_v31 = vld [vmem:[%s1128_s28] ss:$0 sm:$0xff] }
  0x44   : > { %407 = vmatpush.msra.mxu0 %v381_v8  ;;  %p798_p7 = pnand %p797_p6, %p951_p8  ;;  %p803_p0 = por %p802_p13, %p801_p12 }
  0x46   : > { %351 = vadd.xlane.f32.xlu0 %v350_v3  ;;  %p799_p11 = pneg %p798_p7 }
  0x48   : > { %p804_p1 = pnand %p803_p0, %p799_p11 }
  0xb1   : > { %v347_v4 = vpop.xlane.xlu0 %346 }
  0xb2   : > { %v348_v9 = vmul.f32 0.03125, %v347_v4 }
  0xb4   : > { %v354_v11 = vmul.f32 %v348_v9, %v348_v9  ;;  %v357_v24 = vsub.f32 %v343_v0, %v348_v9 }
  0xb9   : > { %v352_v10 = vpop.xlane.xlu0 %351 }
  0xba   : > { %v353_v12 = vmul.f32 0.03125, %v352_v10 }
  0xbc   : > { %v355_v13 = vsub.f32 %v353_v12, %v354_v11 }
  0xbe   : > { %v356_v14 = vmax.f32 %v355_v13, 0.0 }
  0xc0   : > { %v358_v15 = vadd.f32 1e-06, %v356_v14 }
  0xc2   : > { %658 = vrsqrt.f32 %v358_v15  ;;  %vm365_vm2 = vweird.f32 %v358_v15 }
  0xc8   : > { %v659_v16 = vpop.eup %658 }
  0xc9   : > { %v360_v17 = vmul.f32 %v659_v16, %v358_v15  ;;  %vm366_vm1 = vweird.f32 %v659_v16 }
  0xca   : > { %vm367_vm3 = vmor %vm365_vm2, %vm366_vm1 }
  0xcb   : > { %v361_v18 = vmul.f32 %v659_v16, %v360_v17 }
  0xcd   : > { %v362_v20 = vmul.f32 0.5, %v361_v18 }
  0xcf   : > { %v363_v22 = vsub.f32 1.5, %v362_v20 }
  0xd1   : > { %v364_v23 = vmul.f32 %v659_v16, %v363_v22 }
  0xd3   : > { %v368_v26 = vsel %vm367_vm3, %v659_v16, %v364_v23 }
  0xd4   : > { %v369_v27 = vmul.f32 %v368_v26, %v357_v24 }
  0xd6   : > { %v376_v29 = vmul.f32 %v374_v25, %v369_v27 }
  0xd8   : > { %v380_v30 = vadd.f32 %v656_v28, %v376_v29 }
  0xda   : > { %566 = vmatmul.msk.f32.vlgmr.msra.gmra.mxu0 %vm344_vm0, %v380_v30 }
 0x157   : > { %v409_v32 = vpop.f32.mrf.mxu0 }
 0x158   : > { %v410_v33 = vadd.f32 %v657_v31, %v409_v32 }
 0x15a   : > { %412 = vst [vmem:[%s342_s10] sm:$0xff] %v410_v33 }
 0x15b   : > { %807 = shalt.err (!%p804_p1)
}
 0x15c   : > { %581 = dma.vmem_to_hbm [thread:$0]  (%p951_p8), %s428_s11, 128, %s430_s12, %s414_s13  }
 0x15d PF: > { %s1129_s1 = sld [smem:[#allocation15_spill]]  ;;  %p598_p2 = pnand %p559_p10, %p958_p9 }
 0x15e   : > { %s1131_s23 = sld [smem:[#allocation17_spill]] }
 0x15f   : > { %p599_p4 = pneg %p598_p2 }
 0x163   : > { %s441_s4 = sand.u32 1, %s1129_s1  }
 0x164   : > { %s442_s18 = scalar_lea.sflag [#allocation4], %s441_s4 }
 0x165   : > { %845 = dma.done.wait (%p599_p4), %s442_s18, 128  }
 0x166   : > { %847 = vsyncadd (%p599_p4), %s442_s18, 4294967168  ;;  %s25_s23 = sadd.s32 1, %s1131_s23   ;;  %s1132_s26 = sld [smem:[#allocation16_spill]] }
 0x167   : > { %p22_p5 = scmp.ge.s32.totalorder %s25_s23, 4   ;;  %s1133_s20 = sld [smem:[#allocation21_spill]] }
 0x168   : > { %s1134_s29 = sld [smem:[#allocation18_spill]]  ;;  %s1135_s18 = smov %s854_s19 }
 0x169   : > { %s1137_s21 = smov %s866_s22 }
 0x16a   :  { %24 = sbr.rel (!%p22_p5) target bundleno = 13 (0xd), region = 113 }
 0x16c   : > { %s1136_s19 = smov %s1132_s26 }
 0x16e   : > { %s1138_s22 = smov %s1134_s29 }
 0x16f   :  { %448 = vsyncpa [#allocation3], 1 }
 0x170   :  { %450 = vsyncpa [#allocation3 + $0x1], 1 }
 0x171   :  { %451 = vsyncpa [#allocation6], 1 }
 0x172   :  { %453 = vsyncpa [#allocation6 + $0x1], 1 }
 0x173   :  { %454 = vsyncpa [#allocation9], 1 }
 0x174   :  { %455 = vsyncpa [#allocation4], 1 }
 0x175   :  { %457 = vsyncpa [#allocation4 + $0x1], 1 }

// kernel: tpu_custom_call.1
= control target key start
LH: loop header
LB: loop body
LE: loop exit
PB: predicated region body
PF: predicated region fallthrough
CT: control target
= control target key end

     0   :  { %s1096_s0 = inlined_call_operand.hbm [shape: f32[2,8,32], index: 0, kind: input, shape index: {}]   ;;  %s1097_s1 = inlined_call_operand.hbm [shape: f32[2,1,32], index: 1, kind: input, shape index: {}]   ;;  %s1098_s2 = inlined_call_operand.hbm [shape: f32[2,1,32], index: 2, kind: input, shape index: {}]   ;;  %s1099_s3 = inlined_call_operand.hbm [shape: f32[32,128], index: 3, kind: input, shape index: {}]   ;;  %s1100_s4 = inlined_call_operand.vmem [shape: f32[1,128], index: 4, kind: input, shape index: {}]   ;;  %s1101_s5 = inlined_call_operand.hbm [shape: f32[2,8,128], index: 5, kind: output, shape index: {}]  }
   0x1   :  { %1110 = sst [smem:[#allocation22_spill]] %s1097_s1 }
   0x2   :  { %1111 = sst [smem:[#allocation23_spill]] %s1099_s3 }
   0x3   :  { %1112 = sst [smem:[#allocation24_spill]] %s1100_s4 }
   0x4   :  { %10 = vsyncpa [#allocation3], 0 }
   0x5   :  { %12 = vsyncpa [#allocation3 + $0x1], 0 }
   0x6   :  { %13 = vsyncpa [#allocation6], 0 }
   0x7   :  { %15 = vsyncpa [#allocation6 + $0x1], 0 }
   0x8   :  { %16 = vsyncpa [#allocation9], 0 }
   0x9   :  { %17 = vsyncpa [#allocation4], 0 }
   0xa   :  { %19 = vsyncpa [#allocation4 + $0x1], 0  ;;  %s905_s18 = smov 0   ;;  %s907_s19 = smov 0  }
   0xb   :  { %s909_s20 = smov 0   ;;  %s911_s21 = smov 0  }
   0xc   :  { %s913_s22 = smov 0   ;;  %s915_s23 = smov 0  }
   0xd LB: > { %1113 = sst [smem:[#allocation15_spill]] %s850_s18  ;;  %s936_s24 = sadd.s32 4294967295, %s870_s23   ;;  %s870_s23 = sphi %s915_s23, %s25_s23   ;;  %s866_s22 = sphi %s913_s22, %s1138_s22   ;;  %s862_s21 = sphi %s911_s21, %s1137_s21   ;;  %s858_s20 = sphi %s909_s20, %s1133_s20   ;;  %s854_s19 = sphi %s907_s19, %s1136_s19   ;;  %s850_s18 = sphi %s905_s18, %s1135_s18  }
   0xe   : > { %1114 = sst [smem:[#allocation16_spill]] %s858_s20  ;;  %s556_s25 = sadd.s32 4294967294, %s870_s23  }
   0xf   : > { %1115 = sst [smem:[#allocation17_spill]] %s870_s23  ;;  %s37_s26 = sadd.s32 1, %s866_s22 }
  0x10   : > { %s46_s27 = sadd.s32 1, %s858_s20  ;;  %p39_p0 = scmp.ge.s32.totalorder %s37_s26, 2 }
  0x11   : > { %p53_p1 = scmp.ne.s32.totalorder %s858_s20, %s854_s19  ;;  %p54_p2 = scmp.eq.s32.totalorder %s870_s23, 0 }
  0x12   : > { %p59_p3 = scmp.ne.s32.totalorder %s854_s19, %s850_s18  ;;  %s1140_s26 = smov (%p39_p0, %s37_s26), 0 }
  0x13   : > { %1116 = sst [smem:[#allocation18_spill]] %s1140_s26  ;;  %p55_p4 = por %p54_p2, %p53_p1 }
  0x14   : > { %p179_p5 = scmp.eq.s32.totalorder %s936_s24, 1  ;;  %s41_s28 = ssub.s32 %s866_s22, %s1140_s26 }
  0x15   : > { %p185_p6 = scmp.eq.s32.totalorder %s556_s25, 1  ;;  %p44_p7 = scmp.eq.s32.totalorder %s41_s28, 0 }
  0x16   : > { %p951_p8 = por %p179_p5, %p53_p1  ;;  %p559_p10 = scmp.ge.s32.totalorder %s870_s23, 2 }
  0x17   : > { %p958_p9 = por %p185_p6, %p59_p3  ;;  %p602_p11 = scmp.lt.s32.totalorder %s870_s23, 2 }
  0x18   : > { %s1117_s29 = scalar_select %p951_p8, 1, 0 }
  0x19   : > { %s1119_s30 = scalar_select %p958_p9, 1, 0 }
  0x1a   : > { %1118 = sst [smem:[#allocation19_spill]] %s1117_s29  ;;  %s968_s7 = sand.u32 1, %s858_s20  }
  0x1b   : > { %1120 = sst [smem:[#allocation20_spill]] %s1119_s30  ;;  %s242_s8 = sand.u32 1, %s870_s23  }
  0x1c   : > { %s963_s6 = scalar_select %p44_p7, %s858_s20, %s46_s27  }
  0x1d   : > { %p971_p12 = pnand %p602_p11, %p55_p4  ;;  %s1123_s1 = sld [smem:[#allocation22_spill]] }
  0x1e   : > { %1121 = sst [smem:[#allocation21_spill]] %s963_s6  ;;  %s245_s14 = scalar_lea.vmem [#allocation5], %s968_s7 }
  0x1f   : > { %s252_s15 = sshll.u32 %s245_s14, 4  ;;  %s980_s16 = scalar_lea.sflag [#allocation6], %s242_s8  ;;  %s253_s15 = int_to_ptr.vmem [resolvable:$true] %s252_s15 }
  0x20   : > { %p60_p13 = scmp.eq.s32.totalorder %s936_s24, 0  ;;  %p557_p0 = scmp.ge.s32.totalorder %s870_s23, 1 }
  0x21   : > { %p192_p1 = scmp.lt.s32.totalorder %s870_s23, 3  ;;  %s1125_s3 = sld [smem:[#allocation23_spill]] }
  0x22   : > { %p993_p2 = por %p60_p13, %p59_p3  ;;  %s872_s8 = smov [#allocation8]  }
  0x23   : > { %s248_s12 = scalar_lea.hbm %s1123_s1, %s866_s22  ;;  %p1000_p4 = pnand %p557_p0, %p192_p1 }
  0x24   : > { %s250_s13 = sshll.u32 %s248_s12, 4  ;;  %s205_s11 = sshll.u32 %s872_s8, 4  ;;  %s251_s13 = int_to_ptr.hbm [resolvable:$true] %s250_s13  ;;  %s206_s11 = int_to_ptr.vmem [resolvable:$true] %s205_s11 }
  0x25   : > { %593 = dma.hbm_to_vmem [thread:$0]  (!%p971_p12), %s251_s13, 16, %s253_s15, %s980_s16  }
  0x26   : > { %p583_p5 = pneg %p1000_p4  ;;  %s560_s12 = sshll.u32 %s968_s7, 3 }
  0x27   : > { %s203_s28 = sshll.u32 %s1125_s3, 4  ;;  %s561_s13 = sshll.u32 %s866_s22, 3  ;;  %s204_s28 = int_to_ptr.hbm [resolvable:$true] %s203_s28 }
  0x28   : > { %p584_p3 = pnand %p583_p5, %p60_p13  ;;  %s873_s14 = smov 128  }
  0x29   : > { %s874_s15 = smov 8   ;;  %s231_s1 = scalar_lea.hbm %s1096_s0, %s561_s13 }
  0x2a   : > { %586 = dma.hbm_to_vmem [thread:$0]  (!%p584_p3), %s204_s28, 512, %s206_s11, [#allocation9], %s873_s14, %s873_s14, %s874_s15  }
  0x2b   : > { %s226_s3 = scalar_lea.vmem [#allocation2], %s560_s12  ;;  %s233_s6 = sshll.u32 %s231_s1, 4  ;;  %s234_s6 = int_to_ptr.hbm [resolvable:$true] %s233_s6 }
  0x2c   : > { %s235_s26 = sshll.u32 %s226_s3, 4  ;;  %s223_s8 = scalar_lea.sflag [#allocation3], %s968_s7  ;;  %s236_s26 = int_to_ptr.vmem [resolvable:$true] %s235_s26 }
  0x2d   : > { %590 = dma.hbm_to_vmem [thread:$0]  (!%p971_p12), %s234_s6, 128, %s236_s26, %s223_s8  }
  0x2e   : > { %s265_s30 = scalar_lea.hbm %s1098_s2, %s866_s22  ;;  %s262_s18 = scalar_lea.vmem [#allocation7], %s968_s7 }
  0x2f   : > { %s269_s4 = sshll.u32 %s262_s18, 4  ;;  %s267_s29 = sshll.u32 %s265_s30, 4  ;;  %s270_s4 = int_to_ptr.vmem [resolvable:$true] %s269_s4  ;;  %s268_s29 = int_to_ptr.hbm [resolvable:$true] %s267_s29 }
  0x30   : > { %596 = dma.hbm_to_vmem [thread:$0]  (!%p971_p12), %s268_s29, 16, %s270_s4, %s980_s16  }
  0x31   : > { %278 = sbr.rel (%p1000_p4) target bundleno = 349 (0x15d), region = 40  ;;  %s1027_s1 = sand.u32 (!%p1000_p4), 1, %s854_s19  }
  0x32   : > { %s563_s3 = sshll.u32 (!%p1000_p4), %s1027_s1, 3  ;;  %s281_s20 = scalar_lea.sflag (!%p1000_p4), [#allocation3], %s1027_s1 }
  0x33   : > { %s284_s23 = scalar_lea.vmem (!%p1000_p4), [#allocation2], %s563_s3 }
  0x36   : > { %833 = dma.done.wait (%p993_p2), %s281_s20, 128  }
  0x37   : > { %835 = vsyncadd (%p993_p2), %s281_s20, 4294967168  ;;  %s290_s4 = sand.u32 1, %s936_s24   ;;  %s293_s26 = scalar_lea.vmem [#allocation5], %s1027_s1 }
  0x38   : > { %s291_s18 = scalar_lea.sflag [#allocation6], %s290_s4 }
  0x39   : > { %837 = dma.done.wait (%p993_p2), %s291_s18, 32  }
  0x3a   : > { %839 = vsyncadd (%p993_p2), %s291_s18, 4294967264  ;;  %s302_s29 = scalar_lea.vmem [#allocation7], %s1027_s1 }
  0x3b   : > { %841 = dma.done.wait (%p60_p13), [#allocation9], 512  }
  0x3c   : > { %843 = vsyncadd (%p60_p13), [#allocation9], 4294966784  ;;  %vm344_vm0 = vcmask 261120   ;;  %v343_v0 = vld [vmem:[%s284_s23] sm:$0xff]  ;;  %v381_v8 = vld [vmem:[#allocation8] sm:$0xff]  ;;  %s568_s24 = sshll.u32 %s862_s21, 3 }
  0x3d   : > { %v345_v1 = vsel %vm344_vm0, %v343_v0, 0.0  ;;  %v349_v2 = vmul.f32 %v343_v0, %v343_v0  ;;  %v384_v5 = vld [vmem:[#allocation8 + $0x18] sm:$0xff]  ;;  %v383_v6 = vld [vmem:[#allocation8 + $0x10] sm:$0xff]  ;;  %v382_v7 = vld [vmem:[#allocation8 + $0x8] sm:$0xff]  ;;  %s425_s9 = scalar_lea.hbm %s1101_s5, %s568_s24  ;;  %s1128_s28 = sld [smem:[#allocation24_spill]] }
  0x3e   : > { %346 = vadd.xlane.f32.xlu0 %v345_v1  ;;  %404 = vmatpush.msra.mxu0 %v384_v5  ;;  %v371_v19 = vld [vmem:[%s302_s29] sm:$0x1]  ;;  %s342_s10 = scalar_lea.vmem [#allocation10], %s563_s3  ;;  %s429_s12 = sshll.u32 %s425_s9, 4  ;;  %s430_s12 = int_to_ptr.hbm [resolvable:$true] %s429_s12 }
  0x3f   : > { %v350_v3 = vsel %vm344_vm0, %v349_v2, 0.0  ;;  %v372_v21 = vadd.f32 1.0, %v371_v19  ;;  %v656_v28 = vld [vmem:[%s293_s26] ss:$0 sm:$0xff]  ;;  %s427_s11 = sshll.u32 %s342_s10, 4  ;;  %s414_s13 = scalar_lea.sflag [#allocation4], %s1027_s1  ;;  %s428_s11 = int_to_ptr.vmem [resolvable:$true] %s427_s11 }
  0x40   : > { %405 = vmatpush.msra.mxu0 %v383_v6  ;;  %s794_s21 = sshra.s32 %s430_s12, 4  ;;  %s800_s27 = scalar_lea.hbm %s1101_s5, 16  ;;  %s795_s21 = int_to_ptr.hbm [resolvable:$true] %s794_s21 }
  0x41   : > { %v374_v25 = vperm.slane %v372_v21, 0  ;;  %s796_s14 = scalar_lea.hbm %s795_s21, 8  ;;  %p801_p12 = scmp.lt.s32.totalorder %s795_s21, %s1101_s5 }
  0x42   : > { %406 = vmatpush.msra.mxu0 %v382_v7  ;;  %p797_p6 = scmp.ne.s32.totalorder %s795_s21, %s796_s14  ;;  %p802_p13 = scmp.lt.s32.totalorder %s800_s27, %s796_s14 }
  0x43   : > { %v657_v31 = vld [vmem:[%s1128_s28] ss:$0 sm:$0xff] }
  0x44   : > { %407 = vmatpush.msra.mxu0 %v381_v8  ;;  %p798_p7 = pnand %p797_p6, %p951_p8  ;;  %p803_p0 = por %p802_p13, %p801_p12 }
  0x46   : > { %351 = vadd.xlane.f32.xlu0 %v350_v3  ;;  %p799_p11 = pneg %p798_p7 }
  0x48   : > { %p804_p1 = pnand %p803_p0, %p799_p11 }
  0xb1   : > { %v347_v4 = vpop.xlane.xlu0 %346 }
  0xb2   : > { %v348_v9 = vmul.f32 0.03125, %v347_v4 }
  0xb4   : > { %v354_v11 = vmul.f32 %v348_v9, %v348_v9  ;;  %v357_v24 = vsub.f32 %v343_v0, %v348_v9 }
  0xb9   : > { %v352_v10 = vpop.xlane.xlu0 %351 }
  0xba   : > { %v353_v12 = vmul.f32 0.03125, %v352_v10 }
  0xbc   : > { %v355_v13 = vsub.f32 %v353_v12, %v354_v11 }
  0xbe   : > { %v356_v14 = vmax.f32 %v355_v13, 0.0 }
  0xc0   : > { %v358_v15 = vadd.f32 1e-06, %v356_v14 }
  0xc2   : > { %658 = vrsqrt.f32 %v358_v15  ;;  %vm365_vm2 = vweird.f32 %v358_v15 }
  0xc8   : > { %v659_v16 = vpop.eup %658 }
  0xc9   : > { %v360_v17 = vmul.f32 %v659_v16, %v358_v15  ;;  %vm366_vm1 = vweird.f32 %v659_v16 }
  0xca   : > { %vm367_vm3 = vmor %vm365_vm2, %vm366_vm1 }
  0xcb   : > { %v361_v18 = vmul.f32 %v659_v16, %v360_v17 }
  0xcd   : > { %v362_v20 = vmul.f32 0.5, %v361_v18 }
  0xcf   : > { %v363_v22 = vsub.f32 1.5, %v362_v20 }
  0xd1   : > { %v364_v23 = vmul.f32 %v659_v16, %v363_v22 }
  0xd3   : > { %v368_v26 = vsel %vm367_vm3, %v659_v16, %v364_v23 }
  0xd4   : > { %v369_v27 = vmul.f32 %v368_v26, %v357_v24 }
  0xd6   : > { %v376_v29 = vmul.f32 %v374_v25, %v369_v27 }
  0xd8   : > { %v380_v30 = vadd.f32 %v656_v28, %v376_v29 }
  0xda   : > { %566 = vmatmul.msk.f32.vlgmr.msra.gmra.mxu0 %vm344_vm0, %v380_v30 }
 0x157   : > { %v409_v32 = vpop.f32.mrf.mxu0 }
 0x158   : > { %v410_v33 = vadd.f32 %v657_v31, %v409_v32 }
 0x15a   : > { %412 = vst [vmem:[%s342_s10] sm:$0xff] %v410_v33 }
 0x15b   : > { %807 = shalt.err (!%p804_p1)
}
 0x15c   : > { %581 = dma.vmem_to_hbm [thread:$0]  (%p951_p8), %s428_s11, 128, %s430_s12, %s414_s13  }
 0x15d PF: > { %s1129_s1 = sld [smem:[#allocation15_spill]]  ;;  %p598_p2 = pnand %p559_p10, %p958_p9 }
 0x15e   : > { %s1131_s23 = sld [smem:[#allocation17_spill]] }
 0x15f   : > { %p599_p4 = pneg %p598_p2 }
 0x163   : > { %s441_s4 = sand.u32 1, %s1129_s1  }
 0x164   : > { %s442_s18 = scalar_lea.sflag [#allocation4], %s441_s4 }
 0x165   : > { %845 = dma.done.wait (%p599_p4), %s442_s18, 128  }
 0x166   : > { %847 = vsyncadd (%p599_p4), %s442_s18, 4294967168  ;;  %s25_s23 = sadd.s32 1, %s1131_s23   ;;  %s1132_s26 = sld [smem:[#allocation16_spill]] }
 0x167   : > { %p22_p5 = scmp.ge.s32.totalorder %s25_s23, 4   ;;  %s1133_s20 = sld [smem:[#allocation21_spill]] }
 0x168   : > { %s1134_s29 = sld [smem:[#allocation18_spill]]  ;;  %s1135_s18 = smov %s854_s19 }
 0x169   : > { %s1137_s21 = smov %s866_s22 }
 0x16a   :  { %24 = sbr.rel (!%p22_p5) target bundleno = 13 (0xd), region = 113 }
 0x16c   : > { %s1136_s19 = smov %s1132_s26 }
 0x16e   : > { %s1138_s22 = smov %s1134_s29 }
 0x16f   :  { %448 = vsyncpa [#allocation3], 1 }
 0x170   :  { %450 = vsyncpa [#allocation3 + $0x1], 1 }
 0x171   :  { %451 = vsyncpa [#allocation6], 1 }
 0x172   :  { %453 = vsyncpa [#allocation6 + $0x1], 1 }
 0x173   :  { %454 = vsyncpa [#allocation9], 1 }
 0x174   :  { %455 = vsyncpa [#allocation4], 1 }
 0x175   :  { %457 = vsyncpa [#allocation4 + $0x1], 1 }

</bundles_post_ra>
